<compile_context>
chip_gen: v5e
topology: v5e:2x2
jax: 0.10.0
libtpu: 0.0.40
codegen_flags: <defaults>
</compile_context>

<pallas_src>
import math

import jax
import jax.numpy as jnp
from jax.experimental import pallas as pl
from jax.experimental.pallas import tpu as pltpu


# ----------------------------- Pallas kernel ------------------------------ #

def _matmul_bias_kernel(x_ref, w_ref, b_ref, o_ref, acc_ref):
    """One (tm, tn) output tile, accumulated over the K grid axis.

    x_ref: (tm, tk) bf16      w_ref: (tk, tn) bf16 (weight already transposed
    to (K, N) and adapted with alpha*delta outside the kernel)
    b_ref: (1, tn) f32        o_ref: (tm, tn) f32    acc_ref: (tm, tn) f32
    """
    k = pl.program_id(2)

    @pl.when(k == 0)
    def _():
        acc_ref[...] = jnp.zeros_like(acc_ref)

    acc_ref[...] += jax.lax.dot_general(
        x_ref[...], w_ref[...],
        dimension_numbers=(((1,), (0,)), ((), ())),
        preferred_element_type=jnp.float32,
    )

    @pl.when(k == pl.num_programs(2) - 1)
    def _():
        o_ref[...] = (acc_ref[...] + b_ref[...]).astype(o_ref.dtype)


def _pick_tile(dim, target, align):
    """Largest multiple of `align` <= target that evenly divides `dim`,
    falling back to the full dimension (always legal on TPU)."""
    if dim <= target or dim % align != 0:
        return dim
    t = (min(target, dim) // align) * align
    while dim % t != 0:
        t -= align
    return t


def ttlora_linear(x2d, w_kn, bias, *, tm=None, tn=None, tk=None,
                  out_dtype=jnp.float32):
    """y = x2d @ w_kn + bias, computed in Pallas on the MXU.

    x2d:  (M, K) bf16 activations
    w_kn: (K, N) bf16 adapted weight (already W + alpha*delta, transposed)
    bias: (N,)   f32
    """
    M, K = x2d.shape
    K2, N = w_kn.shape
    assert K == K2 and bias.shape == (N,)

    tm = _pick_tile(M, 256, 8) if tm is None else tm
    tn = _pick_tile(N, 512, 128) if tn is None else tn
    tk = _pick_tile(K, 512, 128) if tk is None else tk

    bias2d = bias.reshape(1, N).astype(jnp.float32)
    grid = (M // tm, N // tn, K // tk)

    return pl.pallas_call(
        _matmul_bias_kernel,
        out_shape=jax.ShapeDtypeStruct((M, N), out_dtype),
        grid_spec=pltpu.PrefetchScalarGridSpec(
            num_scalar_prefetch=0,
            grid=grid,
            in_specs=[
                pl.BlockSpec((tm, tk), lambda i, j, k: (i, k)),   # activations
                pl.BlockSpec((tk, tn), lambda i, j, k: (k, j)),   # adapted W^T
                pl.BlockSpec((1, tn), lambda i, j, k: (0, j)),    # bias row
            ],
            out_specs=pl.BlockSpec((tm, tn), lambda i, j, k: (i, j)),
            scratch_shapes=[pltpu.VMEM((tm, tn), jnp.float32)],
        ),
        compiler_params=pltpu.CompilerParams(
            dimension_semantics=("parallel", "parallel", "arbitrary"),
            # Explicit scoped-VMEM budget; the default tile budget above uses
            # only a few MiB, well under v7x's 64 MiB physical VMEM.
            vmem_limit_bytes=64 * 1024 * 1024,
        ),
    )(x2d, w_kn, bias2d)


# ---------------------- TT reconstruction (plain JAX glue) ----------------- #

def tt_reconstruct(cores):
    """Equivalent of torch.einsum('ijk,klm,mno,opq->jlnp', ...) for any number
    of cores: contract shared rank indices, sum the two boundary rank indices
    (they appear once and are absent from the output)."""
    res = cores[0]                                 # (r0, n0, r1)
    r0 = res.shape[0]
    for c in cores[1:]:                            # c: (r, n, r_next)
        res = res.reshape(r0, -1, res.shape[-1])   # (r0, prod_n, r)
        res = jnp.einsum('amk,knr->amnr', res, c)
        res = res.reshape(r0, -1, c.shape[-1])
    return jnp.sum(res, axis=(0, 2))               # flat, length prod(tt_shape)


# ------------------------- Module-equivalent wrapper ----------------------- #

class TTLoRALinearReconstruction:
    """JAX/Pallas counterpart of TTLoRALinearWrapper_Reconstruction.

    Naming note: the PyTorch module sets
        in_features, out_features = base.weight.shape == (N, K)
    i.e. its "in_features" is the weight's row dim (the linear's output size N)
    and its "out_features" is the weight's column dim (the linear's input size
    K).  We keep explicit (N, K) names to stay unambiguous.
    """

    def __init__(self, N, K, tt_shape, tt_rank, alpha, key):
        assert math.prod(tt_shape) == N * K
        assert len(tt_rank) == len(tt_shape) + 1
        self.N, self.K = N, K
        self.tt_shape = tuple(tt_shape)
        self.tt_rank = tuple(tt_rank)
        self.alpha = alpha

        k_w, k_b, k_c = jax.random.split(key, 3)
        # Base nn.Linear(K, N) default init: U(-1/sqrt(K), 1/sqrt(K))
        bound = 1.0 / math.sqrt(K)
        self.weight = jax.random.uniform(
            k_w, (N, K), jnp.float32, minval=-bound, maxval=bound)
        self.bias = jax.random.uniform(
            k_b, (N,), jnp.float32, minval=-bound, maxval=bound)

        # TT cores, shape (rank[i], tt_shape[i], rank[i+1]), init_core
        # distribution: randn * 1/sqrt(tt_shape[i]).
        # TODO(synk): the PyTorch module overwrites these with
        # tensor_train(W_delta) (external TT-SVD dependency); we keep the
        # module's deterministic init_core distribution instead.
        self.tt_cores = []
        core_keys = jax.random.split(k_c, len(tt_shape))
        for i, n_i in enumerate(tt_shape):
            std = 1.0 / math.sqrt(n_i)
            core = jax.random.normal(
                core_keys[i], (tt_rank[i], n_i, tt_rank[i + 1]),
                jnp.float32) * std
            self.tt_cores.append(core)

        self._w_kn_bf16 = None   # cached adapted weight, (K, N) bf16

    # Adapted weight is recomputed only when the cache is invalidated (i.e.
    # once per weight update), not on every forward call.
    def _adapted_weight_kn_bf16(self):
        if self._w_kn_bf16 is None:
            # Matches the PyTorch forward: the TT delta is applied only when
            # alpha > 0.
            if self.alpha > 0:
                delta = tt_reconstruct(self.tt_cores).reshape(self.N, self.K)
                w_adapt = self.weight + jnp.float32(self.alpha) * delta
            else:
                w_adapt = self.weight
            # Pre-transpose to (K, N) and cast to bf16 once so the Pallas
            # kernel sees a lane-dense RHS and MXU-native dtype.
            self._w_kn_bf16 = jnp.asarray(w_adapt.T, dtype=jnp.bfloat16)
            self._w_kn_bf16 = jax.block_until_ready(self._w_kn_bf16)
        return self._w_kn_bf16

    def __call__(self, x):
        # x: (..., K) -> (..., N)
        lead = x.shape[:-1]
        x2d = x.reshape(-1, self.K).astype(jnp.bfloat16)
        w_kn = self._adapted_weight_kn_bf16()
        y2d = ttlora_linear(x2d, w_kn, self.bias)
        return y2d.reshape(*lead, self.N)


# ---------------------------------- main ----------------------------------- #

if __name__ == "__main__":
    key = jax.random.PRNGKey(0)
    k_mod, k_x = jax.random.split(key)

    # Small shapes: base Linear(K=64 -> N=32), x = (batch=2, seq=8, hidden=64).
    N, K = 32, 64
    tt_shape = (8, 4, 8, 8)          # prod = 2048 = N * K  (4 cores)
    tt_rank = (1, 2, 2, 2, 1)
    alpha = 8

    mod = TTLoRALinearReconstruction(N, K, tt_shape, tt_rank, alpha, k_mod)
    x = jax.random.normal(k_x, (2, 8, K), jnp.float32)

    y = mod(x)
    y = jax.block_until_ready(y)

    # Pure-JAX reference.  The kernel intentionally feeds bf16 operands to the
    # MXU (f32 accumulation), so the reference applies the same bf16 rounding
    # to its inputs for an apples-to-apples comparison.
    delta_ref = tt_reconstruct(mod.tt_cores).reshape(N, K)
    w_adapt = mod.weight + alpha * delta_ref
    xb = x.astype(jnp.bfloat16).astype(jnp.float32)
    wb = w_adapt.astype(jnp.bfloat16).astype(jnp.float32)
    y_ref = jnp.einsum('bsk,nk->bsn', xb, wb) + mod.bias

    assert y.shape == (2, 8, N), y.shape
    assert jnp.allclose(y, y_ref, atol=1e-4, rtol=1e-4), (
        float(jnp.max(jnp.abs(y - y_ref))))

    print("KERNEL_OK")
</pallas_src>

<mosaic_0001>
module attributes {stable_mosaic.version = 11 : i64} {
  func.func @_matmul_bias_kernel(%arg0: i32, %arg1: i32, %arg2: i32, %arg3: memref<16x64xbf16, #tpu.memory_space<vmem>>, %arg4: memref<64x32xbf16, #tpu.memory_space<vmem>>, %arg5: memref<1x32xf32, #tpu.memory_space<vmem>>, %arg6: memref<16x32xf32, #tpu.memory_space<vmem>>, %arg7: memref<16x32xf32, #tpu.memory_space<vmem>>) attributes {dimension_semantics = [#tpu.dimension_semantics<parallel>, #tpu.dimension_semantics<parallel>, #tpu.dimension_semantics<arbitrary>], iteration_bounds = array<i64: 1, 1, 1>, scalar_prefetch = 0 : i64, scratch_operands = 1 : i64, tpu.core_type = #tpu.core_type<tc>, window_params = [{transform_indices = @transform_0, window_bounds = array<i64: 16, 64>}, {transform_indices = @transform_1, window_bounds = array<i64: 64, 32>}, {transform_indices = @transform_2, window_bounds = array<i64: 1, 32>}, {transform_indices = @transform_3, window_bounds = array<i64: 16, 32>}]} {
    %c0_i32 = arith.constant 0 : i32
    %0 = arith.cmpi eq, %arg2, %c0_i32 : i32
    %1 = arith.extui %0 : i1 to i32
    %c0_i32_0 = arith.constant 0 : i32
    %2 = arith.cmpi ne, %1, %c0_i32_0 : i32
    scf.if %2 {
      %cst_10 = arith.constant 0.000000e+00 : f32
      %12 = vector.broadcast %cst_10 : f32 to vector<16x32xf32>
      %c0_11 = arith.constant 0 : index
      %c0_12 = arith.constant 0 : index
      %13 = vector.load %arg7[%c0_11, %c0_12] : memref<16x32xf32, #tpu.memory_space<vmem>>, vector<16x32xf32>
      tpu.vector_store %arg7[%c0_11, %c0_12], %12 {strides = array<i32>} : memref<16x32xf32, #tpu.memory_space<vmem>>, vector<16x32xf32>,
    } else {
    }
    %c0 = arith.constant 0 : index
    %c0_1 = arith.constant 0 : index
    %3 = vector.load %arg7[%c0, %c0_1] : memref<16x32xf32, #tpu.memory_space<vmem>>, vector<16x32xf32>
    %c0_2 = arith.constant 0 : index
    %c0_3 = arith.constant 0 : index
    %4 = vector.load %arg3[%c0_2, %c0_3] : memref<16x64xbf16, #tpu.memory_space<vmem>>, vector<16x64xbf16>
    %c0_4 = arith.constant 0 : index
    %c0_5 = arith.constant 0 : index
    %5 = vector.load %arg4[%c0_4, %c0_5] : memref<64x32xbf16, #tpu.memory_space<vmem>>, vector<64x32xbf16>
    %cst = arith.constant dense<0.000000e+00> : vector<16x32xf32>
    %6 = tpu.matmul %4, %5, %cst {dimension_numbers = #tpu.dot_dimension_numbers<[1], [0], [0], [1], [0, 0, 1, 1], [], []>} : vector<16x64xbf16>, vector<64x32xbf16>, vector<16x32xf32> -> vector<16x32xf32>
    %7 = arith.addf %3, %6 : vector<16x32xf32>
    %c0_6 = arith.constant 0 : index
    %c0_7 = arith.constant 0 : index
    %8 = vector.load %arg7[%c0_6, %c0_7] : memref<16x32xf32, #tpu.memory_space<vmem>>, vector<16x32xf32>
    tpu.vector_store %arg7[%c0_6, %c0_7], %7 {strides = array<i32>} : memref<16x32xf32, #tpu.memory_space<vmem>>, vector<16x32xf32>,
    %c0_i32_8 = arith.constant 0 : i32
    %9 = arith.cmpi eq, %arg2, %c0_i32_8 : i32
    %10 = arith.extui %9 : i1 to i32
    %c0_i32_9 = arith.constant 0 : i32
    %11 = arith.cmpi ne, %10, %c0_i32_9 : i32
    scf.if %11 {
      %c0_10 = arith.constant 0 : index
      %c0_11 = arith.constant 0 : index
      %12 = vector.load %arg7[%c0_10, %c0_11] : memref<16x32xf32, #tpu.memory_space<vmem>>, vector<16x32xf32>
      %c0_12 = arith.constant 0 : index
      %c0_13 = arith.constant 0 : index
      %13 = vector.load %arg5[%c0_12, %c0_13] : memref<1x32xf32, #tpu.memory_space<vmem>>, vector<1x32xf32>
      %14 = vector.broadcast %13 : vector<1x32xf32> to vector<16x32xf32>
      %15 = arith.addf %12, %14 : vector<16x32xf32>
      %c0_14 = arith.constant 0 : index
      %c0_15 = arith.constant 0 : index
      %16 = vector.load %arg6[%c0_14, %c0_15] : memref<16x32xf32, #tpu.memory_space<vmem>>, vector<16x32xf32>
      tpu.vector_store %arg6[%c0_14, %c0_15], %15 {strides = array<i32>} : memref<16x32xf32, #tpu.memory_space<vmem>>, vector<16x32xf32>,
    } else {
    }
    return
  }
  func.func @transform_0(%arg0: i32, %arg1: i32, %arg2: i32) -> (i32, i32) {
    %c0_i32 = arith.constant 0 : i32
    return %arg0, %arg2 : i32, i32
  }
  func.func @transform_1(%arg0: i32, %arg1: i32, %arg2: i32) -> (i32, i32) {
    %c0_i32 = arith.constant 0 : i32
    return %arg2, %arg1 : i32, i32
  }
  func.func @transform_2(%arg0: i32, %arg1: i32, %arg2: i32) -> (i32, i32) {
    %c0_i32 = arith.constant 0 : i32
    %c0_i32_0 = arith.constant 0 : i32
    return %c0_i32, %arg1 : i32, i32
  }
  func.func @transform_3(%arg0: i32, %arg1: i32, %arg2: i32) -> (i32, i32) {
    %c0_i32 = arith.constant 0 : i32
    return %arg0, %arg1 : i32, i32
  }
}

</mosaic_0001>

<bundles_post_ra>
// kernel: tpu_custom_call.1
= control target key start
LH: loop header
LB: loop body
LE: loop exit
PB: predicated region body
PF: predicated region fallthrough
CT: control target
= control target key end

     0   :  { %vm20_vm0 = vcmask 261120   ;;  %v175_v1 = vmov 0.0   ;;  %s226_s0 = inlined_call_operand.vmem [shape: bf16[16,64], index: 0, kind: input, shape index: {}]   ;;  %s227_s1 = inlined_call_operand.vmem [shape: bf16[64,32], index: 1, kind: input, shape index: {}]   ;;  %s228_s2 = inlined_call_operand.vmem [shape: f32[1,32], index: 2, kind: input, shape index: {}]   ;;  %s229_s3 = inlined_call_operand.hbm [shape: f32[16,32], index: 3, kind: output, shape index: {}]  }
   0x1   :  { %v143_v0 = vld [vmem:[%s227_s1 + $0x18] sm:$0xff]  ;;  %21 = vst.msk [vmem:[#allocation2] sm:$0xff] %vm20_vm0, %v175_v1 }
   0x2   :  { %8 = vsyncpa [#allocation4], 0  ;;  %72 = vmatpush.bf16.msra.mxu0 %v143_v0  ;;  %v142_v2 = vld [vmem:[%s227_s1 + $0x10] sm:$0xff]  ;;  %22 = vst.msk [vmem:[#allocation2 + $0x8] sm:$0xff] %vm20_vm0, %v175_v1  ;;  %v141_v3 = vld [vmem:[%s227_s1 + $0x8] sm:$0xff]  ;;  %vm64_vm1 = vcmask 523264  }
   0x3   :  { %v140_v4 = vld [vmem:[%s227_s1] sm:$0xff]  ;;  %s106_s26 = sshll.u32 %s229_s3, 4  ;;  %s178_s27 = smov 8   ;;  %s107_s26 = int_to_ptr.hbm [resolvable:$true] %s106_s26 }
   0x4   :  { %v139_v5 = vld [vmem:[%s226_s0] sm:$0xff]  ;;  %s176_s0 = smov [#allocation3]  }
   0x5   :  { %v148_v10 = vld [vmem:[%s228_s2] ss:$0 sm:$0xff]  ;;  %s104_s1 = sshll.u32 %s176_s0, 4  ;;  %s177_s2 = smov 128   ;;  %s105_s1 = int_to_ptr.vmem [resolvable:$true] %s104_s1 }
   0x6   :  { %73 = vmatpush.bf16.msra.mxu0 %v142_v2 }
   0x8   :  { %v23_v6 = vld [vmem:[#allocation2] sm:$0xff] }
   0x9   :  { %v24_v9 = vld [vmem:[#allocation2 + $0x8] sm:$0xff] }
   0xa   :  { %74 = vmatpush.bf16.msra.mxu0 %v141_v3 }
   0xe   :  { %75 = vmatpush.bf16.msra.mxu0 %v140_v4 }
  0x11   :  { %138 = vmatmul.msk.bf16.vlgmr.msra.gmra.mxu0 %vm64_vm1, %v139_v5 }
  0x8e   :  { %v77_v7 = vpop.f32.mrf.mxu0 }
  0x8f   :  { %v82_v8 = vadd.f32 %v77_v7, %v23_v6 }
  0x91   :  { %85 = vst.msk [vmem:[#allocation2] sm:$0xff] %vm20_vm0, %v82_v8 }
  0x96   :  { %v79_v11 = vpop.f32.mrf.mxu0 }
  0x97   :  { %v83_v12 = vadd.f32 %v79_v11, %v24_v9 }
  0x98   :  { %v90_v13 = vld [vmem:[#allocation2] sm:$0xff] }
  0x99   :  { %86 = vst.msk [vmem:[#allocation2 + $0x8] sm:$0xff] %vm20_vm0, %v83_v12  ;;  %v96_v14 = vadd.f32 %v148_v10, %v90_v13 }
  0x9b   :  { %98 = vst.msk [vmem:[#allocation3] sm:$0xff] %vm20_vm0, %v96_v14 }
  0xa0   :  { %v91_v15 = vld [vmem:[#allocation2 + $0x8] sm:$0xff] }
  0xa1   :  { %v97_v16 = vadd.f32 %v148_v10, %v91_v15 }
  0xa3   :  { %99 = vst.msk [vmem:[#allocation3 + $0x8] sm:$0xff] %vm20_vm0, %v97_v16 }
  0xa4   :  { %112 = dma.vmem_to_hbm [thread:$0]  %s105_s1, 256, %s107_s26, [#allocation4], %s177_s2, %s177_s2, %s178_s27  }
  0xa5   :  { %173 = dma.done.wait [#allocation4], 256  }
  0xa6   :  { %174 = vsyncadd [#allocation4], 4294967040 }
  0xa7   :  { %117 = vsyncpa [#allocation4], 1 }

</bundles_post_ra>
